<compile_context>
chip_gen: v5e
topology: v5e:2x2
jax: 0.10.0
libtpu: 0.0.40
codegen_flags: <defaults>
</compile_context>

<pallas_src>
import functools

import jax
import jax.numpy as jnp
from jax import lax
from jax.experimental import pallas as pl
from jax.experimental.pallas import tpu as pltpu


def _xent_kernel(logits_ref, label_ref, out_ref, *,
                 n_valid: int, tile_n: int, mask_rows: bool):
    """One (tile_n, C) logits tile -> one f32 partial sum of row losses."""
    logits = logits_ref[...].astype(jnp.float32)          # (tile_n, C)
    labels = label_ref[...]                                # (tile_n, 1) int32

    # Numerically-stable log-sum-exp along the class axis (XLU reduce + EUP).
    m = jnp.max(logits, axis=-1, keepdims=True)            # (tile_n, 1)
    lse = m + jnp.log(jnp.sum(jnp.exp(logits - m), axis=-1, keepdims=True))

    # logits[row, label[row]] via a vectorized one-hot (no gather).
    class_ids = lax.broadcasted_iota(jnp.int32, logits.shape, 1)
    picked = jnp.sum(jnp.where(class_ids == labels, logits, 0.0),
                     axis=-1, keepdims=True)                # (tile_n, 1)

    loss = lse - picked                                     # (tile_n, 1)

    if mask_rows:  # only the ragged-batch case pays for the mask
        i = pl.program_id(0)
        row_ids = i * tile_n + lax.broadcasted_iota(jnp.int32, (tile_n, 1), 0)
        loss = jnp.where(row_ids < n_valid, loss, 0.0)

    partial = jnp.sum(loss, axis=0, keepdims=True)          # (1, 1)
    # Lane-dense store: broadcast the scalar across one 128-lane row.
    out_ref[...] = partial + jnp.zeros((1, 128), jnp.float32)


def _plan_tiles(n: int, c: int, dtype):
    """Choose tile_n and an explicit VMEM limit with full accounting."""
    itemsize = jnp.dtype(dtype).itemsize

    # Generation-aware physical VMEM (v7x: 64 MiB, v5e/v6e: 128 MiB).
    try:
        physical = int(pltpu.get_tpu_info().vmem_capacity_bytes)
    except Exception:
        physical = 64 * 1024 * 1024          # conservative (v7x-sized) default
    budget = min(physical // 2, 64 * 1024 * 1024)

    # Per-row VMEM footprint:
    #   2x double-buffered logits block (native dtype)
    # + ~5 f32/int32 (tile_n, C) temporaries (f32 upcast, exp, iota, select, ...)
    # + 2x double-buffered (tile_n, 1) int32 label block padded to 128 lanes
    per_row = 2 * c * itemsize + 5 * c * 4 + 2 * 128 * 4

    vmem_rows = max(8, budget // per_row)
    # Target ~4 MiB of logits per step so DMA dominates the ~0.35 us/step cost.
    target_rows = max(8, (4 * 1024 * 1024) // max(1, c * itemsize))
    tile = int(min(vmem_rows, target_rows))

    # Keep >= 8 grid steps (both v7x TCs fed, pipeline stays warm) as long as
    # each step still moves a reasonably large logits block (>= 512 KiB).
    min_dma_rows = max(8, (512 * 1024) // max(1, c * itemsize))
    eight_step_rows = (n // 8 // 8) * 8
    if eight_step_rows >= min_dma_rows:
        tile = min(tile, eight_step_rows)

    tile = max(8, (tile // 8) * 8)
    tile = min(tile, max(8, (n // 8) * 8))    # never larger than the batch

    vmem_limit = per_row * tile + (8 << 20)   # headroom for Mosaic internals
    vmem_limit = max(vmem_limit, 16 << 20)
    vmem_limit = min(vmem_limit, physical - (8 << 20))
    return tile, int(vmem_limit)


def crossentropy_loss(pre, label, rep_anchor=None, rep_candidate=None):
    """Matches Crossentropy_Loss.forward: CrossEntropyLoss(pre, label), mean."""
    del rep_anchor, rep_candidate            # unused by the reference forward()
    N, C = pre.shape
    itemsize = jnp.dtype(pre.dtype).itemsize

    tile_n, vmem_limit = _plan_tiles(N, C, pre.dtype)
    num_tiles = pl.cdiv(N, tile_n)
    mask_rows = (N % tile_n) != 0            # ragged edge block needs masking

    lbl2d = label.astype(jnp.int32).reshape(N, 1)

    kernel = functools.partial(_xent_kernel, n_valid=N, tile_n=tile_n,
                               mask_rows=mask_rows)

    partials = pl.pallas_call(
        kernel,
        out_shape=jax.ShapeDtypeStruct((num_tiles, 128), jnp.float32),
        grid=(num_tiles,),
        in_specs=[
            pl.BlockSpec((tile_n, C), lambda i: (i, 0)),   # logits tile
            pl.BlockSpec((tile_n, 1), lambda i: (i, 0)),   # labels tile
        ],
        out_specs=pl.BlockSpec((1, 128), lambda i: (i, 0)),  # lane-dense partial
        compiler_params=pltpu.CompilerParams(
            dimension_semantics=("parallel",),
            vmem_limit_bytes=vmem_limit),
        cost_estimate=pl.CostEstimate(
            flops=6 * N * C,
            transcendentals=N * C + N,
            bytes_accessed=N * C * itemsize + N * 4 + int(num_tiles) * 128 * 4),
    )(pre, lbl2d)

    # Tiny final reduction in plain JAX (mean reduction, torch default).
    return jnp.sum(partials[:, 0]) / jnp.float32(N)


def _reference(pre, label):
    logp = jax.nn.log_softmax(pre.astype(jnp.float32), axis=-1)
    nll = -jnp.take_along_axis(logp, label.astype(jnp.int32)[:, None], axis=-1)
    return jnp.mean(nll)


if __name__ == "__main__":
    key = jax.random.PRNGKey(0)
    k1, k2, k3, k4 = jax.random.split(key, 4)

    # Small shapes consistent with the module: batch=8, classes=32.
    N, C = 8, 32
    pre = jax.random.normal(k1, (N, C), dtype=jnp.float32)
    label = jax.random.randint(k2, (N,), 0, C, dtype=jnp.int32)
    # rep_anchor / rep_candidate exist in the signature but are unused.
    rep_anchor = jnp.zeros((N, 16), jnp.float32)
    rep_candidate = jnp.zeros((N, 16), jnp.float32)

    out = crossentropy_loss(pre, label, rep_anchor, rep_candidate)
    out = jax.block_until_ready(out)
    ref = _reference(pre, label)
    assert jnp.allclose(out, ref, rtol=1e-5, atol=1e-5), (out, ref)

    # Also exercise the ragged-batch (masked edge block) path once.
    N2 = 13
    pre2 = jax.random.normal(k3, (N2, C), dtype=jnp.float32)
    label2 = jax.random.randint(k4, (N2,), 0, C, dtype=jnp.int32)
    out2 = jax.block_until_ready(crossentropy_loss(pre2, label2, None, None))
    ref2 = _reference(pre2, label2)
    assert jnp.allclose(out2, ref2, rtol=1e-5, atol=1e-5), (out2, ref2)

    print("KERNEL_OK")
</pallas_src>

<mosaic_0001>
module attributes {stable_mosaic.version = 11 : i64} {
  func.func @_xent_kernel(%arg0: i32, %arg1: memref<8x32xf32, #tpu.memory_space<vmem>>, %arg2: memref<8x1xi32, #tpu.memory_space<vmem>>, %arg3: memref<1x128xf32, #tpu.memory_space<vmem>>) attributes {dimension_semantics = [#tpu.dimension_semantics<parallel>], iteration_bounds = array<i64: 1>, scalar_prefetch = 0 : i64, scratch_operands = 0 : i64, tpu.core_type = #tpu.core_type<tc>, window_params = [{transform_indices = @transform_0, window_bounds = array<i64: 8, 32>}, {transform_indices = @transform_1, window_bounds = array<i64: 8, 1>}, {transform_indices = @transform_2, window_bounds = array<i64: 1, 128>}]} {
    %c0 = arith.constant 0 : index
    %c0_0 = arith.constant 0 : index
    %0 = vector.load %arg1[%c0, %c0_0] : memref<8x32xf32, #tpu.memory_space<vmem>>, vector<8x32xf32>
    %c0_1 = arith.constant 0 : index
    %c0_2 = arith.constant 0 : index
    %1 = vector.load %arg2[%c0_1, %c0_2] : memref<8x1xi32, #tpu.memory_space<vmem>>, vector<8x1xi32>
    %cst = arith.constant dense<0xFF800000> : vector<8xf32>
    %2 = vector.multi_reduction <maximumf>, %0, %cst [1] : vector<8x32xf32> to vector<8xf32>
    %3 = vector.shape_cast %2 : vector<8xf32> to vector<8x1xf32>
    %4 = vector.broadcast %3 : vector<8x1xf32> to vector<8x32xf32>
    %5 = arith.subf %0, %4 : vector<8x32xf32>
    %6 = math.exp %5 : vector<8x32xf32>
    %cst_3 = arith.constant dense<0.000000e+00> : vector<8xf32>
    %7 = vector.multi_reduction <add>, %6, %cst_3 [1] : vector<8x32xf32> to vector<8xf32>
    %8 = vector.shape_cast %7 : vector<8xf32> to vector<8x1xf32>
    %9 = math.log %8 : vector<8x1xf32>
    %10 = arith.addf %3, %9 : vector<8x1xf32>
    %11 = tpu.iota {dimensions = array<i32: 1>} : vector<8x32xi32>
    %12 = vector.broadcast %1 : vector<8x1xi32> to vector<8x32xi32>
    %13 = arith.cmpi eq, %11, %12 : vector<8x32xi32>
    %cst_4 = arith.constant 0.000000e+00 : f32
    %14 = vector.broadcast %cst_4 : f32 to vector<8x32xf32>
    %15 = arith.select %13, %0, %14 : vector<8x32xi1>, vector<8x32xf32>
    %cst_5 = arith.constant dense<0.000000e+00> : vector<8xf32>
    %16 = vector.multi_reduction <add>, %15, %cst_5 [1] : vector<8x32xf32> to vector<8xf32>
    %17 = vector.shape_cast %16 : vector<8xf32> to vector<8x1xf32>
    %18 = arith.subf %10, %17 : vector<8x1xf32>
    %cst_6 = arith.constant dense<0.000000e+00> : vector<1xf32>
    %19 = vector.multi_reduction <add>, %18, %cst_6 [0] : vector<8x1xf32> to vector<1xf32>
    %20 = vector.shape_cast %19 : vector<1xf32> to vector<1x1xf32>
    %cst_7 = arith.constant 0.000000e+00 : f32
    %21 = vector.broadcast %cst_7 : f32 to vector<1x128xf32>
    %22 = vector.broadcast %20 : vector<1x1xf32> to vector<1x128xf32>
    %23 = arith.addf %22, %21 : vector<1x128xf32>
    %c0_8 = arith.constant 0 : index
    %c0_9 = arith.constant 0 : index
    %24 = vector.load %arg3[%c0_8, %c0_9] : memref<1x128xf32, #tpu.memory_space<vmem>>, vector<1x128xf32>
    tpu.vector_store %arg3[%c0_8, %c0_9], %23 {strides = array<i32>} : memref<1x128xf32, #tpu.memory_space<vmem>>, vector<1x128xf32>,
    return
  }
  func.func @transform_0(%arg0: i32) -> (i32, i32) {
    %c0_i32 = arith.constant 0 : i32
    %c0_i32_0 = arith.constant 0 : i32
    return %arg0, %c0_i32 : i32, i32
  }
  func.func @transform_1(%arg0: i32) -> (i32, i32) {
    %c0_i32 = arith.constant 0 : i32
    %c0_i32_0 = arith.constant 0 : i32
    return %arg0, %c0_i32 : i32, i32
  }
  func.func @transform_2(%arg0: i32) -> (i32, i32) {
    %c0_i32 = arith.constant 0 : i32
    %c0_i32_0 = arith.constant 0 : i32
    return %arg0, %c0_i32 : i32, i32
  }
}

</mosaic_0001>

<bundles_post_ra>
// kernel: tpu_custom_call.1
= control target key start
LH: loop header
LB: loop body
LE: loop exit
PB: predicated region body
PF: predicated region fallthrough
CT: control target
= control target key end

     0   :  { %vm14_vm0 = vcmask 261120   ;;  %s124_s0 = inlined_call_operand.vmem [shape: f32[8,32], index: 0, kind: input, shape index: {}]   ;;  %s125_s1 = inlined_call_operand.vmem [shape: s32[8,1], index: 1, kind: input, shape index: {}]   ;;  %s126_s2 = inlined_call_operand.hbm [shape: f32[1,128], index: 2, kind: output, shape index: {}]  }
   0x1   :  { %v12_v0 = vld [vmem:[%s124_s0] sm:$0xff] }
   0x2   :  { %7 = vsyncpa [#allocation3], 0  ;;  %v15_v1 = vsel %vm14_vm0, %v12_v0, -inf  ;;  %v95_v2 = vmov 0   ;;  %v13_v3 = vld [vmem:[%s125_s1] sm:$0xff]  ;;  %v27_v9 = vlaneseq  ;;  %s96_s0 = smov [#allocation2]  }
   0x3   :  { %64 = vset.pattern.permute.xlu0 %v95_v2  ;;  %s51_s1 = sshll.u32 %s96_s0, 4  ;;  %s53_s15 = sshll.u32 %s126_s2, 4  ;;  %s52_s1 = int_to_ptr.vmem [resolvable:$true] %s51_s1  ;;  %s54_s15 = int_to_ptr.hbm [resolvable:$true] %s53_s15 }
   0x4   :  { %16 = vmax.xlane.f32.xlu0 %v15_v1  ;;  %v28_v10 = vand.u32 127, %v27_v9 }
  0x18   :  { %30 = vperm.xlu0 %64, %v13_v3  }
  0x77   :  { %v17_v4 = vpop.xlane.xlu0 %16 }
  0x78   :  { %v18_v5 = vsub.f32 %v12_v0, %v17_v4 }
  0x7a   :  { %v19_v6 = vmul.f32 1.442695, %v18_v5 }
  0x7c   :  { %65 = vpow2.f32 %v19_v6 }
  0x82   :  { %v66_v7 = vpop.eup %65 }
  0x83   :  { %v21_v8 = vsel %vm14_vm0, %v66_v7, 0.0 }
  0x84   :  { %22 = vadd.xlane.f32.xlu1 %v21_v8 }
  0x8a   :  { %v31_v11 = vpop.permute.xlu0 %30 }
  0x8b   :  { %vm32_vm1 = vcmp.eq.s32.totalorder %v28_v10, %v31_v11 }
  0x8c   :  { %v33_v12 = vsel %vm32_vm1, %v12_v0, 0.0 }
  0x8d   :  { %v34_v13 = vsel %vm14_vm0, %v33_v12, 0.0 }
  0x8e   :  { %35 = vadd.xlane.f32.xlu1 %v34_v13 }
  0xf7   :  { %v23_v14 = vpop.xlane.xlu1 %22 }
  0xf8   :  { %67 = vlog2.f32 %v23_v14 }
  0xfe   :  { %v68_v15 = vpop.eup %67 }
  0xff   :  { %v25_v16 = vmul.f32 0.6931472, %v68_v15 }
 0x101   :  { %v26_v17 = vadd.f32 %v25_v16, %v17_v4  ;;  %v36_v18 = vpop.xlane.xlu1 %35 }
 0x103   :  { %v37_v19 = vsub.f32 %v26_v17, %v36_v18 }
 0x105   :  { %v38_v20 = vrot.slane %v37_v19, 4 }
 0x107   :  { %v39_v21 = vadd.f32 %v38_v20, %v37_v19 }
 0x109   :  { %v40_v22 = vrot.slane %v39_v21, 2 }
 0x10b   :  { %v41_v23 = vadd.f32 %v40_v22, %v39_v21 }
 0x10d   :  { %v42_v24 = vrot.slane %v41_v23, 1 }
 0x10f   :  { %v43_v25 = vadd.f32 %v42_v24, %v41_v23 }
 0x111   :  { %45 = vst [vmem:[#allocation2] sm:$0x1] %v43_v25 }
 0x112   :  { %56 = dma.vmem_to_hbm [thread:$0]  %s52_s1, 16, %s54_s15, [#allocation3]  }
 0x113   :  { %93 = dma.done.wait [#allocation3], 16  }
 0x114   :  { %94 = vsyncadd [#allocation3], 4294967280 }
 0x115   :  { %61 = vsyncpa [#allocation3], 1 }

</bundles_post_ra>
